<compile_context>
chip_gen: v5e
topology: v5e:2x2
jax: 0.10.0
libtpu: 0.0.40
codegen_flags: <defaults>
</compile_context>

<pallas_src>
import jax
import jax.numpy as jnp
from jax import lax
from jax.experimental import pallas as pl
from jax.experimental.pallas import tpu as pltpu

EPS = 1e-6
LANES = 128
MAX_TILE_ROWS = 8192     # 8192 * 128 * 4 B = 4 MiB per f32 input block


def _cdiv(a, b):
    return -(-a // b)


def _round_up(x, m):
    return _cdiv(x, m) * m


def _num_splits():
    """2-way grid split only on multi-TensorCore chips (v7x); 1 elsewhere."""
    try:
        kind = jax.devices()[0].device_kind.lower()
    except Exception:
        return 1
    return 2 if ("v7" in kind or "7x" in kind) else 1


def _make_kernel(rows, tile_rows, steps, acc_rows, needs_mask):
    groups = tile_rows // acc_rows

    def kernel(pred_ref, gt_ref, mask_ref, out_ref):
        c = pl.program_id(0)   # parallel split (one per TensorCore on v7x)
        i = pl.program_id(1)   # streaming reduction step

        @pl.when(i == 0)
        def _():
            out_ref[...] = jnp.zeros_like(out_ref)

        # In-kernel cast: sub-f32 / int8 inputs stream from HBM at native
        # width and are widened on the VPU.
        p = pred_ref[...].astype(jnp.float32)
        g = gt_ref[...].astype(jnp.float32)
        m = mask_ref[...].astype(jnp.float32)

        def accumulate(num, den):
            # acc_rows/8 independent (8,128) accumulation chains: critical
            # path is (groups - 1) dependent vadds instead of tile_rows/8 - 1.
            num_p = num.reshape(groups, acc_rows, LANES).sum(axis=0)
            den_p = den.reshape(groups, acc_rows, LANES).sum(axis=0)
            out_ref[0, 0] += num_p
            out_ref[0, 1] += den_p

        if needs_mask:
            row0 = (c * steps + i) * tile_rows
            is_interior = row0 + tile_rows <= rows

            @pl.when(is_interior)
            def _():
                # Interior blocks skip the iota/compare/where entirely.
                accumulate(jnp.abs(p - g) * m, m)

            @pl.when(jnp.logical_not(is_interior))
            def _():
                # Mask AFTER the elementwise compute so stale-VMEM garbage
                # (possibly NaN) in the unread part of a partial / duplicated
                # block can never reach the accumulator.
                ridx = row0 + lax.broadcasted_iota(
                    jnp.int32, (tile_rows, LANES), 0)
                valid = ridx < rows
                accumulate(jnp.where(valid, jnp.abs(p - g) * m, 0.0),
                           jnp.where(valid, m, 0.0))
        else:
            accumulate(jnp.abs(p - g) * m, m)

    return kernel


def _prep_value(x):
    # pred / gt: keep floating dtypes native (bf16 streams at half the bytes);
    # rare int inputs widen on host.
    if not jnp.issubdtype(x.dtype, jnp.floating):
        x = x.astype(jnp.float32)
    return x.reshape(-1)


def _prep_mask(x):
    # bool / int masks stream at 1 B/elem; the kernel widens to f32.
    if not jnp.issubdtype(x.dtype, jnp.floating):
        x = x.astype(jnp.int8)
    return x.reshape(-1)


def mask_l1_loss(pred, gt, mask, eps=EPS):
    """Pallas implementation of MaskL1Loss.forward. Returns a scalar f32."""
    assert pred.shape == gt.shape == mask.shape

    pred_f, gt_f, mask_f = _prep_value(pred), _prep_value(gt), _prep_mask(mask)
    total = pred_f.shape[0]

    # Rare slow path: numel % 128 != 0 needs a host-side zero pad of < 128
    # elements (zero pad is benign: |0 - 0| * 0 adds nothing to num or den).
    # TODO(synk): avoid the full-array pad copy via 1-D blocks + lane mask.
    if total % LANES != 0:
        pad = LANES - total % LANES
        pred_f = jnp.pad(pred_f, (0, pad))
        gt_f = jnp.pad(gt_f, (0, pad))
        mask_f = jnp.pad(mask_f, (0, pad))

    rows = pred_f.shape[0] // LANES
    pred2 = pred_f.reshape(rows, LANES)
    gt2 = gt_f.reshape(rows, LANES)
    mask2 = mask_f.reshape(rows, LANES)

    num_splits = _num_splits()

    # Tile sizing: multiple of 32 keeps every dtype's native sublane tiling
    # (incl. int8 masks) happy; 8192 rows x 3 f32 inputs x 2 pipeline buffers
    # = 24 MiB, under the 32 MiB scoped-VMEM limit on all generations.
    tile_rows = min(MAX_TILE_ROWS, _round_up(rows, 32))
    acc_rows = 64 if tile_rows % 64 == 0 else 32
    steps = _cdiv(rows, num_splits * tile_rows)
    n_row_blocks = _cdiv(rows, tile_rows)
    needs_mask = (num_splits * steps * tile_rows) != rows

    def in_map(c, i):
        # Clamp so every DMA starts in bounds; logical blocks that fall
        # entirely past the end are zeroed by the in-kernel boundary mask.
        return (jnp.minimum(c * steps + i, n_row_blocks - 1), 0)

    in_spec = pl.BlockSpec((tile_rows, LANES), in_map)
    # Output block index ignores the reduction axis -> resident accumulator.
    out_spec = pl.BlockSpec((1, 2, acc_rows, LANES), lambda c, i: (c, 0, 0, 0))

    kernel = _make_kernel(rows, tile_rows, steps, acc_rows, needs_mask)

    partials = pl.pallas_call(
        kernel,
        out_shape=jax.ShapeDtypeStruct((num_splits, 2, acc_rows, LANES),
                                       jnp.float32),
        grid_spec=pltpu.PrefetchScalarGridSpec(
            num_scalar_prefetch=0,
            grid=(num_splits, steps),
            in_specs=[in_spec, in_spec, in_spec],
            out_specs=out_spec,
        ),
        compiler_params=pltpu.CompilerParams(
            dimension_semantics=("parallel", "arbitrary"),
            vmem_limit_bytes=32 * 1024 * 1024,
        ),
    )(pred2, gt2, mask2)

    # One fused XLA reduce for both quantities, then the scalar division.
    sums = partials.sum(axis=(0, 2, 3))
    # torch.mean on a scalar is the identity.
    return sums[0] / (sums[1] + jnp.float32(eps))


def _reference(pred, gt, mask, eps=EPS):
    return (jnp.abs(pred - gt) * mask).sum() / (mask.sum() + eps)


if __name__ == "__main__":
    key = jax.random.PRNGKey(0)
    k1, k2, k3 = jax.random.split(key, 3)

    N, C, H, W = 2, 4, 16, 16   # NCHW, matching the PyTorch module's usage
    pred = jax.random.uniform(k1, (N, C, H, W), dtype=jnp.float32)
    gt = jax.random.uniform(k2, (N, C, H, W), dtype=jnp.float32)
    mask = (jax.random.uniform(k3, (N, C, H, W), dtype=jnp.float32) > 0.5
            ).astype(jnp.float32)

    loss = jax.block_until_ready(jax.jit(mask_l1_loss)(pred, gt, mask))
    ref = _reference(pred, gt, mask)

    assert jnp.allclose(loss, ref, rtol=1e-5, atol=1e-6), (loss, ref)
    print("KERNEL_OK")
</pallas_src>

<mosaic_0001>
module attributes {stable_mosaic.version = 11 : i64} {
  func.func @kernel(%arg0: i32, %arg1: i32, %arg2: memref<32x128xf32, #tpu.memory_space<vmem>>, %arg3: memref<32x128xf32, #tpu.memory_space<vmem>>, %arg4: memref<32x128xf32, #tpu.memory_space<vmem>>, %arg5: memref<1x2x32x128xf32, #tpu.memory_space<vmem>>) attributes {dimension_semantics = [#tpu.dimension_semantics<parallel>, #tpu.dimension_semantics<arbitrary>], iteration_bounds = array<i64: 1, 1>, scalar_prefetch = 0 : i64, scratch_operands = 0 : i64, tpu.core_type = #tpu.core_type<tc>, window_params = [{transform_indices = @transform_0, window_bounds = array<i64: 32, 128>}, {transform_indices = @transform_1, window_bounds = array<i64: 32, 128>}, {transform_indices = @transform_2, window_bounds = array<i64: 32, 128>}, {transform_indices = @transform_3, window_bounds = array<i64: 1, 2, 32, 128>}]} {
    %c0_i32 = arith.constant 0 : i32
    %0 = arith.cmpi eq, %arg1, %c0_i32 : i32
    %1 = arith.extui %0 : i1 to i32
    %c0_i32_0 = arith.constant 0 : i32
    %2 = arith.cmpi ne, %1, %c0_i32_0 : i32
    scf.if %2 {
      %cst = arith.constant 0.000000e+00 : f32
      %16 = vector.broadcast %cst : f32 to vector<1x2x32x128xf32>
      %c0_9 = arith.constant 0 : index
      %c0_10 = arith.constant 0 : index
      %c0_11 = arith.constant 0 : index
      %c0_12 = arith.constant 0 : index
      %17 = vector.load %arg5[%c0_9, %c0_10, %c0_11, %c0_12] : memref<1x2x32x128xf32, #tpu.memory_space<vmem>>, vector<1x2x32x128xf32>
      tpu.vector_store %arg5[%c0_9, %c0_10, %c0_11, %c0_12], %16 {strides = array<i32>} : memref<1x2x32x128xf32, #tpu.memory_space<vmem>>, vector<1x2x32x128xf32>,
    } else {
    }
    %c0 = arith.constant 0 : index
    %c0_1 = arith.constant 0 : index
    %3 = vector.load %arg2[%c0, %c0_1] : memref<32x128xf32, #tpu.memory_space<vmem>>, vector<32x128xf32>
    %c0_2 = arith.constant 0 : index
    %c0_3 = arith.constant 0 : index
    %4 = vector.load %arg3[%c0_2, %c0_3] : memref<32x128xf32, #tpu.memory_space<vmem>>, vector<32x128xf32>
    %c0_4 = arith.constant 0 : index
    %c0_5 = arith.constant 0 : index
    %5 = vector.load %arg4[%c0_4, %c0_5] : memref<32x128xf32, #tpu.memory_space<vmem>>, vector<32x128xf32>
    %c1_i32 = arith.constant 1 : i32
    %6 = arith.muli %arg0, %c1_i32 : i32
    %7 = arith.addi %6, %arg1 : i32
    %c32_i32 = arith.constant 32 : i32
    %8 = arith.muli %7, %c32_i32 : i32
    %c32_i32_6 = arith.constant 32 : i32
    %9 = arith.addi %8, %c32_i32_6 : i32
    %c16_i32 = arith.constant 16 : i32
    %10 = arith.cmpi sle, %9, %c16_i32 : i32
    %11 = arith.extui %10 : i1 to i32
    %c0_i32_7 = arith.constant 0 : i32
    %12 = arith.cmpi ne, %11, %c0_i32_7 : i32
    scf.if %12 {
      %16 = arith.subf %3, %4 : vector<32x128xf32>
      %17 = math.absf %16 : vector<32x128xf32>
      %18 = arith.mulf %17, %5 : vector<32x128xf32>
      %19 = vector.shape_cast %18 : vector<32x128xf32> to vector<1x32x128xf32>
      %cst = arith.constant dense<0.000000e+00> : vector<32x128xf32>
      %20 = vector.multi_reduction <add>, %19, %cst [0] : vector<1x32x128xf32> to vector<32x128xf32>
      %21 = vector.shape_cast %5 : vector<32x128xf32> to vector<1x32x128xf32>
      %cst_9 = arith.constant dense<0.000000e+00> : vector<32x128xf32>
      %22 = vector.multi_reduction <add>, %21, %cst_9 [0] : vector<1x32x128xf32> to vector<32x128xf32>
      %c0_10 = arith.constant 0 : index
      %c0_11 = arith.constant 0 : index
      %c0_12 = arith.constant 0 : index
      %c0_13 = arith.constant 0 : index
      %23 = vector.load %arg5[%c0_10, %c0_11, %c0_12, %c0_13] : memref<1x2x32x128xf32, #tpu.memory_space<vmem>>, vector<1x1x32x128xf32>
      %24 = vector.shape_cast %23 : vector<1x1x32x128xf32> to vector<32x128xf32>
      %25 = arith.addf %24, %20 : vector<32x128xf32>
      %c0_14 = arith.constant 0 : index
      %c0_15 = arith.constant 0 : index
      %c0_16 = arith.constant 0 : index
      %c0_17 = arith.constant 0 : index
      %26 = vector.load %arg5[%c0_14, %c0_15, %c0_16, %c0_17] : memref<1x2x32x128xf32, #tpu.memory_space<vmem>>, vector<1x1x32x128xf32>
      %27 = vector.shape_cast %26 : vector<1x1x32x128xf32> to vector<32x128xf32>
      %28 = vector.shape_cast %25 : vector<32x128xf32> to vector<1x1x32x128xf32>
      tpu.vector_store %arg5[%c0_14, %c0_15, %c0_16, %c0_17], %28 {strides = array<i32>} : memref<1x2x32x128xf32, #tpu.memory_space<vmem>>, vector<1x1x32x128xf32>,
      %c0_18 = arith.constant 0 : index
      %c1 = arith.constant 1 : index
      %c0_19 = arith.constant 0 : index
      %c0_20 = arith.constant 0 : index
      %29 = vector.load %arg5[%c0_18, %c1, %c0_19, %c0_20] : memref<1x2x32x128xf32, #tpu.memory_space<vmem>>, vector<1x1x32x128xf32>
      %30 = vector.shape_cast %29 : vector<1x1x32x128xf32> to vector<32x128xf32>
      %31 = arith.addf %30, %22 : vector<32x128xf32>
      %c0_21 = arith.constant 0 : index
      %c1_22 = arith.constant 1 : index
      %c0_23 = arith.constant 0 : index
      %c0_24 = arith.constant 0 : index
      %32 = vector.load %arg5[%c0_21, %c1_22, %c0_23, %c0_24] : memref<1x2x32x128xf32, #tpu.memory_space<vmem>>, vector<1x1x32x128xf32>
      %33 = vector.shape_cast %32 : vector<1x1x32x128xf32> to vector<32x128xf32>
      %34 = vector.shape_cast %31 : vector<32x128xf32> to vector<1x1x32x128xf32>
      tpu.vector_store %arg5[%c0_21, %c1_22, %c0_23, %c0_24], %34 {strides = array<i32>} : memref<1x2x32x128xf32, #tpu.memory_space<vmem>>, vector<1x1x32x128xf32>,
    } else {
    }
    %true = arith.constant true
    %13 = arith.xori %10, %true : i1
    %14 = arith.extui %13 : i1 to i32
    %c0_i32_8 = arith.constant 0 : i32
    %15 = arith.cmpi ne, %14, %c0_i32_8 : i32
    scf.if %15 {
      %16 = tpu.iota {dimensions = array<i32: 0>} : vector<32x128xi32>
      %17 = vector.broadcast %8 : i32 to vector<32x128xi32>
      %18 = arith.addi %17, %16 : vector<32x128xi32>
      %c16_i32_9 = arith.constant 16 : i32
      %19 = vector.broadcast %c16_i32_9 : i32 to vector<32x128xi32>
      %20 = arith.cmpi slt, %18, %19 : vector<32x128xi32>
      %21 = arith.subf %3, %4 : vector<32x128xf32>
      %22 = math.absf %21 : vector<32x128xf32>
      %23 = arith.mulf %22, %5 : vector<32x128xf32>
      %cst = arith.constant 0.000000e+00 : f32
      %24 = vector.broadcast %cst : f32 to vector<32x128xf32>
      %25 = arith.select %20, %23, %24 : vector<32x128xi1>, vector<32x128xf32>
      %cst_10 = arith.constant 0.000000e+00 : f32
      %26 = vector.broadcast %cst_10 : f32 to vector<32x128xf32>
      %27 = arith.select %20, %5, %26 : vector<32x128xi1>, vector<32x128xf32>
      %28 = vector.shape_cast %25 : vector<32x128xf32> to vector<1x32x128xf32>
      %cst_11 = arith.constant dense<0.000000e+00> : vector<32x128xf32>
      %29 = vector.multi_reduction <add>, %28, %cst_11 [0] : vector<1x32x128xf32> to vector<32x128xf32>
      %30 = vector.shape_cast %27 : vector<32x128xf32> to vector<1x32x128xf32>
      %cst_12 = arith.constant dense<0.000000e+00> : vector<32x128xf32>
      %31 = vector.multi_reduction <add>, %30, %cst_12 [0] : vector<1x32x128xf32> to vector<32x128xf32>
      %c0_13 = arith.constant 0 : index
      %c0_14 = arith.constant 0 : index
      %c0_15 = arith.constant 0 : index
      %c0_16 = arith.constant 0 : index
      %32 = vector.load %arg5[%c0_13, %c0_14, %c0_15, %c0_16] : memref<1x2x32x128xf32, #tpu.memory_space<vmem>>, vector<1x1x32x128xf32>
      %33 = vector.shape_cast %32 : vector<1x1x32x128xf32> to vector<32x128xf32>
      %34 = arith.addf %33, %29 : vector<32x128xf32>
      %c0_17 = arith.constant 0 : index
      %c0_18 = arith.constant 0 : index
      %c0_19 = arith.constant 0 : index
      %c0_20 = arith.constant 0 : index
      %35 = vector.load %arg5[%c0_17, %c0_18, %c0_19, %c0_20] : memref<1x2x32x128xf32, #tpu.memory_space<vmem>>, vector<1x1x32x128xf32>
      %36 = vector.shape_cast %35 : vector<1x1x32x128xf32> to vector<32x128xf32>
      %37 = vector.shape_cast %34 : vector<32x128xf32> to vector<1x1x32x128xf32>
      tpu.vector_store %arg5[%c0_17, %c0_18, %c0_19, %c0_20], %37 {strides = array<i32>} : memref<1x2x32x128xf32, #tpu.memory_space<vmem>>, vector<1x1x32x128xf32>,
      %c0_21 = arith.constant 0 : index
      %c1 = arith.constant 1 : index
      %c0_22 = arith.constant 0 : index
      %c0_23 = arith.constant 0 : index
      %38 = vector.load %arg5[%c0_21, %c1, %c0_22, %c0_23] : memref<1x2x32x128xf32, #tpu.memory_space<vmem>>, vector<1x1x32x128xf32>
      %39 = vector.shape_cast %38 : vector<1x1x32x128xf32> to vector<32x128xf32>
      %40 = arith.addf %39, %31 : vector<32x128xf32>
      %c0_24 = arith.constant 0 : index
      %c1_25 = arith.constant 1 : index
      %c0_26 = arith.constant 0 : index
      %c0_27 = arith.constant 0 : index
      %41 = vector.load %arg5[%c0_24, %c1_25, %c0_26, %c0_27] : memref<1x2x32x128xf32, #tpu.memory_space<vmem>>, vector<1x1x32x128xf32>
      %42 = vector.shape_cast %41 : vector<1x1x32x128xf32> to vector<32x128xf32>
      %43 = vector.shape_cast %40 : vector<32x128xf32> to vector<1x1x32x128xf32>
      tpu.vector_store %arg5[%c0_24, %c1_25, %c0_26, %c0_27], %43 {strides = array<i32>} : memref<1x2x32x128xf32, #tpu.memory_space<vmem>>, vector<1x1x32x128xf32>,
    } else {
    }
    return
  }
  func.func @transform_0(%arg0: i32, %arg1: i32) -> (i32, i32) {
    %c1_i32 = arith.constant 1 : i32
    %0 = arith.muli %arg0, %c1_i32 : i32
    %1 = arith.addi %0, %arg1 : i32
    %c0_i32 = arith.constant 0 : i32
    %2 = arith.minsi %1, %c0_i32 : i32
    %c0_i32_0 = arith.constant 0 : i32
    %c0_i32_1 = arith.constant 0 : i32
    return %2, %c0_i32_0 : i32, i32
  }
  func.func @transform_1(%arg0: i32, %arg1: i32) -> (i32, i32) {
    %c1_i32 = arith.constant 1 : i32
    %0 = arith.muli %arg0, %c1_i32 : i32
    %1 = arith.addi %0, %arg1 : i32
    %c0_i32 = arith.constant 0 : i32
    %2 = arith.minsi %1, %c0_i32 : i32
    %c0_i32_0 = arith.constant 0 : i32
    %c0_i32_1 = arith.constant 0 : i32
    return %2, %c0_i32_0 : i32, i32
  }
  func.func @transform_2(%arg0: i32, %arg1: i32) -> (i32, i32) {
    %c1_i32 = arith.constant 1 : i32
    %0 = arith.muli %arg0, %c1_i32 : i32
    %1 = arith.addi %0, %arg1 : i32
    %c0_i32 = arith.constant 0 : i32
    %2 = arith.minsi %1, %c0_i32 : i32
    %c0_i32_0 = arith.constant 0 : i32
    %c0_i32_1 = arith.constant 0 : i32
    return %2, %c0_i32_0 : i32, i32
  }
  func.func @transform_3(%arg0: i32, %arg1: i32) -> (i32, i32, i32, i32) {
    %c0_i32 = arith.constant 0 : i32
    %c0_i32_0 = arith.constant 0 : i32
    %c0_i32_1 = arith.constant 0 : i32
    %c0_i32_2 = arith.constant 0 : i32
    return %arg0, %c0_i32, %c0_i32_0, %c0_i32_1 : i32, i32, i32, i32
  }
}

</mosaic_0001>

<bundles_post_ra>
// kernel: mask_l1_loss.1
= control target key start
LH: loop header
LB: loop body
LE: loop exit
PB: predicated region body
PF: predicated region fallthrough
CT: control target
= control target key end

     0   :  { %v326_v3 = vmov 0.0   ;;  %s389_s3 = inlined_call_operand.vmem [shape: f32[1,2,32,128], index: 3, kind: output, shape index: {}]   ;;  %s390_s0 = inlined_call_operand.vmem [shape: f32[16,128], index: 0, kind: input, shape index: {}]   ;;  %s391_s1 = inlined_call_operand.vmem [shape: f32[16,128], index: 1, kind: input, shape index: {}]   ;;  %s392_s2 = inlined_call_operand.vmem [shape: f32[16,128], index: 2, kind: input, shape index: {}]  }
   0x1   :  { %v152_v0 = vld [vmem:[%s390_s0] sm:$0xff]  ;;  %272 = vst [vmem:[%s389_s3 + $0x10] sm:$0xff] %v326_v3  ;;  %v153_v5 = vld [vmem:[%s390_s0 + $0x8] sm:$0xff] }
   0x2   :  { %v156_v1 = vld [vmem:[%s391_s1] sm:$0xff]  ;;  %v157_v6 = vld [vmem:[%s391_s1 + $0x8] sm:$0xff]  ;;  %273 = vst [vmem:[%s389_s3 + $0x18] sm:$0xff] %v326_v3 }
   0x3   :  { %v160_v2 = vld [vmem:[%s392_s2] sm:$0xff]  ;;  %v234_v4 = vsub.f32 %v152_v0, %v156_v1  ;;  %v161_v7 = vld [vmem:[%s392_s2 + $0x8] sm:$0xff]  ;;  %v235_v8 = vsub.f32 %v153_v5, %v157_v6  ;;  %323 = vst [vmem:[%s389_s3 + $0x30] sm:$0xff] %v326_v3 }
   0x4   :  { %321 = vst [vmem:[%s389_s3 + $0x20] sm:$0xff] %v160_v2 }
   0x5   :  { %v238_v9 = vand.u32 2147483647, %v234_v4  ;;  %v239_v10 = vand.u32 2147483647, %v235_v8  ;;  %322 = vst [vmem:[%s389_s3 + $0x28] sm:$0xff] %v161_v7 }
   0x6   :  { %324 = vst [vmem:[%s389_s3 + $0x38] sm:$0xff] %v326_v3 }
   0x7   :  { %v242_v11 = vmul.f32 %v238_v9, %v160_v2  ;;  %v243_v12 = vmul.f32 %v239_v10, %v161_v7 }
   0x9   :  { %270 = vst [vmem:[%s389_s3] sm:$0xff] %v242_v11 }
   0xa   :  { %271 = vst [vmem:[%s389_s3 + $0x8] sm:$0xff] %v243_v12 }

</bundles_post_ra>
